<compile_context>
chip_gen: v7x
topology: tpu7x:2x2x1
jax: 0.10.0
libtpu: 0.0.40
codegen_flags: <defaults>
</compile_context>

<pallas_src>
import jax
import jax.numpy as jnp
from jax import lax
from jax.experimental import pallas as pl
from jax.experimental.pallas import tpu as pltpu


def _round_up(x, m):
    return ((x + m - 1) // m) * m


def _pick_tb(B, D_pad, T_pad, budget_bytes):
    """Largest batch tile (<=256, multiple of 8) whose pipeline fits the budget."""
    def vmem_bytes(tb):
        return (2 * tb * D_pad * 4        # image tile, f32, double-buffered
                + 2 * T_pad * D_pad * 4   # resident raw text, f32 (2 bufs)
                + 2 * tb * T_pad * 4      # output tile, f32, double-buffered
                + T_pad * D_pad * 2)      # normalized-text bf16 scratch
    tb = min(256, _round_up(B, 8))
    while tb > 8 and vmem_bytes(tb) > budget_bytes:
        tb = max(8, tb // 2)
    return tb


# ----------------------------------------------------------------------------
# Fused kernel:
#   out[i, j] = exp(logit_scale) * <img_i/||img_i||, txt_j/||txt_j||>
# ----------------------------------------------------------------------------
def fused_logits_kernel(scale_ref, img_ref, txt_ref, out_ref, txtn_ref):
    # One-time work: L2-normalize the text block and fold exp(logit_scale)
    # into it.  txtn_ref is a persistent VMEM scratch, so this runs only on
    # grid step 0 (the grid axis is "arbitrary" -> sequential on one core).
    @pl.when(pl.program_id(0) == 0)
    def _():
        t = txt_ref[...].astype(jnp.float32)
        t_inv = lax.rsqrt(jnp.sum(t * t, axis=-1, keepdims=True) + 1e-12)
        txtn_ref[...] = (t * (scale_ref[0, 0] * t_inv)).astype(jnp.bfloat16)

    # Per batch tile: rsqrt row normalization (EUP), bf16 MXU operands.
    img = img_ref[...].astype(jnp.float32)
    i_inv = lax.rsqrt(jnp.sum(img * img, axis=-1, keepdims=True) + 1e-12)
    img_n = (img * i_inv).astype(jnp.bfloat16)
    # Transpose-free matmul: contract the last (feature) dim of both operands.
    out_ref[...] = lax.dot_general(
        img_n, txtn_ref[...],
        dimension_numbers=(((1,), (1,)), ((), ())),
        preferred_element_type=jnp.float32)          # f32 accumulation


def clip_logits(image_features, text_features, logit_scale):
    """probs = logit_scale.exp() * norm(image_features) @ norm(text_features).T"""
    B, D = image_features.shape
    T, D2 = text_features.shape
    assert D == D2

    D_pad = _round_up(D, 128)                   # lane-aligned contraction dim
    T_pad = _round_up(max(T, 256), 256)         # full MXU width / lane-dense out
    TB = _pick_tb(B, D_pad, T_pad, budget_bytes=24 * 1024 * 1024)
    grid = (pl.cdiv(B, TB),)

    # Image features: NO batch padding (partial last block; garbage rows can
    # only influence output rows >= B, and out_shape has exactly B rows so
    # those writes are masked).  Only D is explicitly zero-padded.
    img = image_features.astype(jnp.float32)
    if D_pad != D:
        img = jnp.pad(img, ((0, 0), (0, D_pad - D)))

    # Text features: small one-time zero pad.  Zero rows normalize to ~0 via
    # the eps, so the padded output columns are exactly 0 and sliced away.
    txt = jnp.zeros((T_pad, D_pad), jnp.float32)
    txt = txt.at[:T, :D].set(text_features.astype(jnp.float32))

    scale = jnp.reshape(jnp.exp(logit_scale.astype(jnp.float32)), (1, 1))

    cost = pl.CostEstimate(
        flops=2 * B * T_pad * D_pad + 3 * (B + T_pad) * D_pad,
        transcendentals=B + T_pad,
        bytes_accessed=4 * B * D_pad + 4 * T_pad * D_pad + 4 * B * T_pad)

    out = pl.pallas_call(
        fused_logits_kernel,
        out_shape=jax.ShapeDtypeStruct((B, T_pad), jnp.float32),
        grid_spec=pltpu.PrefetchScalarGridSpec(
            num_scalar_prefetch=0,
            grid=grid,
            in_specs=[
                # exp(logit_scale) scalar in SMEM (only read at grid step 0).
                pl.BlockSpec((1, 1), lambda i: (0, 0),
                             memory_space=pltpu.MemorySpace.SMEM),
                # image tile marches over the batch axis.
                pl.BlockSpec((TB, D_pad), lambda i: (i, 0)),
                # raw text: constant block index -> DMA'd once, stays resident.
                pl.BlockSpec((T_pad, D_pad), lambda i: (0, 0)),
            ],
            out_specs=pl.BlockSpec((TB, T_pad), lambda i: (i, 0)),
            # Persistent bf16 scratch holding the scaled, normalized text.
            scratch_shapes=[pltpu.VMEM((T_pad, D_pad), jnp.bfloat16)],
        ),
        compiler_params=pltpu.CompilerParams(
            # "arbitrary": the program_id==0 scratch init must run before all
            # other steps on the same core (megacore-safe on v7x).
            dimension_semantics=("arbitrary",),
            vmem_limit_bytes=32 * 1024 * 1024),
        cost_estimate=cost,
    )(scale, img, txt)

    return out[:, :T]


# ----------------------------------------------------------------------------
# Synthetic "CLIP" encoders (glue, plain JAX) with deterministic parameters.
# TODO(synk): real CLIP image/text transformers are external sub-modules and are
# not translated; these stand in for clip_model.encode_image/encode_text.
# ----------------------------------------------------------------------------
def make_synthetic_clip(key, *, img_c, img_hw, vocab, embed_dim):
    k1, k2, k3 = jax.random.split(key, 3)
    flat = img_c * img_hw * img_hw
    w_img = jax.random.normal(k1, (flat, embed_dim), jnp.float32) * 0.02
    tok_emb = jax.random.normal(k2, (vocab, embed_dim), jnp.float32) * 0.02
    w_txt = jax.random.normal(k3, (embed_dim, embed_dim), jnp.float32) * 0.02
    logit_scale = jnp.array(jnp.log(1.0 / 0.07), jnp.float32)     # CLIP init

    def encode_image(images_nchw):                                # [B,C,H,W] -> [B,D]
        b = images_nchw.shape[0]
        return images_nchw.reshape(b, -1) @ w_img

    def encode_text(token_ids):                                   # [T,L] int32 -> [T,D]
        emb = tok_emb[token_ids]                                   # [T,L,D]
        return jnp.mean(emb, axis=1) @ w_txt

    return encode_image, encode_text, logit_scale


# ----------------------------------------------------------------------------
# Pertubation module equivalent
# ----------------------------------------------------------------------------
class Pertubation:
    def __init__(self, pad_h, pad_w, encode_image, encode_text, logit_scale):
        # Mirror __init__ of the PyTorch module (unused in forward()).
        mask = jnp.ones((3, 224, 224), jnp.float32)
        mask = mask.at[:, pad_h:224 - pad_h, pad_w:224 - pad_w].set(0.0)
        self.mask = mask
        self.perturbation = jnp.zeros((3, 224, 224), jnp.float32)
        self.init_state = self.perturbation
        self.encode_image = encode_image
        self.encode_text = encode_text
        self.logit_scale = logit_scale

    def forward(self, images, text_inputs):
        image_features = self.encode_image(images)
        text_features = self.encode_text(text_inputs)
        return clip_logits(image_features, text_features, self.logit_scale)


# ----------------------------------------------------------------------------
def _reference_f32(image_features, text_features, logit_scale):
    i = image_features / jnp.linalg.norm(image_features, axis=-1, keepdims=True)
    t = text_features / jnp.linalg.norm(text_features, axis=-1, keepdims=True)
    return jnp.exp(logit_scale) * (i @ t.T)


def _reference_bf16(image_features, text_features, logit_scale):
    # Replicates the kernel math (rsqrt + eps, scale folded into the text rows,
    # bf16 MXU operands, f32 accumulation).
    scale = jnp.exp(logit_scale.astype(jnp.float32))
    i_inv = lax.rsqrt(jnp.sum(image_features * image_features, -1, keepdims=True) + 1e-12)
    t_inv = lax.rsqrt(jnp.sum(text_features * text_features, -1, keepdims=True) + 1e-12)
    i_n = (image_features * i_inv).astype(jnp.bfloat16)
    t_n = (text_features * (scale * t_inv)).astype(jnp.bfloat16)
    return lax.dot_general(i_n, t_n, (((1,), (1,)), ((), ())),
                           preferred_element_type=jnp.float32)


if __name__ == "__main__":
    key = jax.random.PRNGKey(0)
    k_img, k_txt, k_clip = jax.random.split(key, 3)

    B, C, HW = 8, 3, 16          # small images, NCHW
    T, L, VOCAB = 8, 8, 64       # text prompts: token-id sequences
    D = 128                      # feature (embedding) dim

    images = jax.random.normal(k_img, (B, C, HW, HW), jnp.float32)
    text_inputs = jax.random.randint(k_txt, (T, L), 0, VOCAB, jnp.int32)

    encode_image, encode_text, logit_scale = make_synthetic_clip(
        k_clip, img_c=C, img_hw=HW, vocab=VOCAB, embed_dim=D)

    module = Pertubation(pad_h=16, pad_w=16,
                         encode_image=encode_image,
                         encode_text=encode_text,
                         logit_scale=logit_scale)

    probs = module.forward(images, text_inputs)
    probs = jax.block_until_ready(probs)
    assert probs.shape == (B, T)

    img_f = encode_image(images)
    txt_f = encode_text(text_inputs)

    # Tight check vs a reference replicating the kernel math (bf16 MXU operands).
    ref_bf16 = _reference_bf16(img_f, txt_f, logit_scale)
    if not jnp.allclose(probs, ref_bf16, rtol=2e-3, atol=2e-3):
        raise AssertionError("Pallas kernel mismatch vs bf16-matched reference")

    # Semantic check vs the full-f32 module math (bf16 operand rounding ~1e-2 rel).
    ref_f32 = _reference_f32(img_f, txt_f, logit_scale)
    if not jnp.allclose(probs, ref_f32, rtol=5e-2, atol=5e-2):
        raise AssertionError("Pallas kernel output mismatch vs f32 reference")

    print("KERNEL_OK")
</pallas_src>

<mosaic_0001>
module attributes {stable_mosaic.version = 11 : i64} {
  func.func @fused_logits_kernel(%arg0: i32, %arg1: memref<1x1xf32, #tpu.memory_space<smem>>, %arg2: memref<8x128xf32, #tpu.memory_space<vmem>>, %arg3: memref<256x128xf32, #tpu.memory_space<vmem>>, %arg4: memref<8x256xf32, #tpu.memory_space<vmem>>, %arg5: memref<256x128xbf16, #tpu.memory_space<vmem>>) attributes {dimension_semantics = [#tpu.dimension_semantics<arbitrary>], iteration_bounds = array<i64: 1>, scalar_prefetch = 0 : i64, scratch_operands = 1 : i64, tpu.core_type = #tpu.core_type<tc>, window_params = [{transform_indices = @transform_0, window_bounds = array<i64: 1, 1>}, {transform_indices = @transform_1, window_bounds = array<i64: 8, 128>}, {pipeline_mode = #tpu.pipeline_mode<synchronous>, transform_indices = @transform_2, window_bounds = array<i64: 256, 128>}, {transform_indices = @transform_3, window_bounds = array<i64: 8, 256>}]} {
    %c0_i32 = arith.constant 0 : i32
    %0 = arith.cmpi eq, %arg0, %c0_i32 : i32
    %1 = arith.extui %0 : i1 to i32
    %c0_i32_0 = arith.constant 0 : i32
    %2 = arith.cmpi ne, %1, %c0_i32_0 : i32
    scf.if %2 {
      %c0_8 = arith.constant 0 : index
      %c0_9 = arith.constant 0 : index
      %16 = vector.load %arg3[%c0_8, %c0_9] : memref<256x128xf32, #tpu.memory_space<vmem>>, vector<256x128xf32>
      %17 = arith.mulf %16, %16 : vector<256x128xf32>
      %cst_10 = arith.constant dense<0.000000e+00> : vector<256xf32>
      %18 = vector.multi_reduction <add>, %17, %cst_10 [1] : vector<256x128xf32> to vector<256xf32>
      %19 = vector.shape_cast %18 : vector<256xf32> to vector<256x1xf32>
      %cst_11 = arith.constant 9.99999996E-13 : f32
      %20 = vector.broadcast %cst_11 : f32 to vector<256x1xf32>
      %21 = arith.addf %19, %20 : vector<256x1xf32>
      %22 = math.rsqrt %21 : vector<256x1xf32>
      %c0_12 = arith.constant 0 : index
      %c0_13 = arith.constant 0 : index
      %23 = memref.load %arg1[%c0_12, %c0_13] : memref<1x1xf32, #tpu.memory_space<smem>>
      %24 = vector.broadcast %23 : f32 to vector<256x1xf32>
      %25 = arith.mulf %24, %22 : vector<256x1xf32>
      %26 = vector.broadcast %25 : vector<256x1xf32> to vector<256x128xf32>
      %27 = arith.mulf %16, %26 : vector<256x128xf32>
      %28 = arith.truncf %27 : vector<256x128xf32> to vector<256x128xbf16>
      %c0_14 = arith.constant 0 : index
      %c0_15 = arith.constant 0 : index
      %29 = vector.load %arg5[%c0_14, %c0_15] : memref<256x128xbf16, #tpu.memory_space<vmem>>, vector<256x128xbf16>
      tpu.vector_store %arg5[%c0_14, %c0_15], %28 {strides = array<i32>} : memref<256x128xbf16, #tpu.memory_space<vmem>>, vector<256x128xbf16>,
    } else {
    }
    %c0 = arith.constant 0 : index
    %c0_1 = arith.constant 0 : index
    %3 = vector.load %arg2[%c0, %c0_1] : memref<8x128xf32, #tpu.memory_space<vmem>>, vector<8x128xf32>
    %4 = arith.mulf %3, %3 : vector<8x128xf32>
    %cst = arith.constant dense<0.000000e+00> : vector<8xf32>
    %5 = vector.multi_reduction <add>, %4, %cst [1] : vector<8x128xf32> to vector<8xf32>
    %6 = vector.shape_cast %5 : vector<8xf32> to vector<8x1xf32>
    %cst_2 = arith.constant 9.99999996E-13 : f32
    %7 = vector.broadcast %cst_2 : f32 to vector<8x1xf32>
    %8 = arith.addf %6, %7 : vector<8x1xf32>
    %9 = math.rsqrt %8 : vector<8x1xf32>
    %10 = vector.broadcast %9 : vector<8x1xf32> to vector<8x128xf32>
    %11 = arith.mulf %3, %10 : vector<8x128xf32>
    %12 = arith.truncf %11 : vector<8x128xf32> to vector<8x128xbf16>
    %c0_3 = arith.constant 0 : index
    %c0_4 = arith.constant 0 : index
    %13 = vector.load %arg5[%c0_3, %c0_4] : memref<256x128xbf16, #tpu.memory_space<vmem>>, vector<256x128xbf16>
    %cst_5 = arith.constant dense<0.000000e+00> : vector<8x256xf32>
    %14 = tpu.matmul %12, %13, %cst_5 {dimension_numbers = #tpu.dot_dimension_numbers<[1], [1], [0], [0], [0, 0, 1, 0], [], []>} : vector<8x128xbf16>, vector<256x128xbf16>, vector<8x256xf32> -> vector<8x256xf32>
    %c0_6 = arith.constant 0 : index
    %c0_7 = arith.constant 0 : index
    %15 = vector.load %arg4[%c0_6, %c0_7] : memref<8x256xf32, #tpu.memory_space<vmem>>, vector<8x256xf32>
    tpu.vector_store %arg4[%c0_6, %c0_7], %14 {strides = array<i32>} : memref<8x256xf32, #tpu.memory_space<vmem>>, vector<8x256xf32>,
    return
  }
  func.func @transform_0(%arg0: i32) -> (i32, i32) {
    %c0_i32 = arith.constant 0 : i32
    %c0_i32_0 = arith.constant 0 : i32
    %c0_i32_1 = arith.constant 0 : i32
    return %c0_i32, %c0_i32_0 : i32, i32
  }
  func.func @transform_1(%arg0: i32) -> (i32, i32) {
    %c0_i32 = arith.constant 0 : i32
    %c0_i32_0 = arith.constant 0 : i32
    return %arg0, %c0_i32 : i32, i32
  }
  func.func @transform_2(%arg0: i32) -> (i32, i32) {
    %c0_i32 = arith.constant 0 : i32
    %c0_i32_0 = arith.constant 0 : i32
    %c0_i32_1 = arith.constant 0 : i32
    return %c0_i32, %c0_i32_0 : i32, i32
  }
  func.func @transform_3(%arg0: i32) -> (i32, i32) {
    %c0_i32 = arith.constant 0 : i32
    %c0_i32_0 = arith.constant 0 : i32
    return %arg0, %c0_i32 : i32, i32
  }
}

</mosaic_0001>

<bundles_post_ra>
// kernel: tpu_custom_call.1
= control target key start
LH: loop header
LB: loop body
LE: loop exit
PB: predicated region body
PF: predicated region fallthrough
CT: control target
= control target key end

     0   :  { %9 = vsyncpa [#allocation5], 0  ;;  %s851_s0 = inlined_call_operand.<no memory space> [shape: f32[1,1], index: 0, kind: input, shape index: {}]   ;;  %s852_s1 = inlined_call_operand.hbm [shape: f32[8,128], index: 1, kind: input, shape index: {}]   ;;  %s853_s2 = inlined_call_operand.hbm [shape: f32[256,128], index: 2, kind: input, shape index: {}]   ;;  %s854_s3 = inlined_call_operand.hbm [shape: f32[8,256], index: 3, kind: output, shape index: {}]  }
   0x1   :  { %10 = vsyncpa [#allocation8], 0 }
   0x2   :  { %11 = vsyncpa [#allocation6], 0  ;;  %s581_s12 = smov [#allocation4]   ;;  %s582_s14 = smov [#allocation7]  }
   0x3   :  { %s20_s13 = sshll.u32 %s581_s12, 4  ;;  %s29_s15 = sshll.u32 %s582_s14, 4  ;;  %s21_s13 = int_to_ptr.vmem [resolvable:$true] %s20_s13  ;;  %s606_s15 = int_to_ptr.vmem [resolvable:$true] %s29_s15 }
   0x4   :  { %s509_s18 = scalar_lea.hbm %s852_s1, 128 }
   0x5   :  { %p510_p0 = scmp.ne.s32.totalorder %s852_s1, %s509_s18  ;;  %p513_p1 = scmp.lt.u32.totalorder %s509_s18, %s852_s1 }
   0x7   :  { %p515_p2 = pnand %p513_p1, %p510_p0 }
   0x9   :  { %518 = shalt.err (!%p515_p2)
}
   0xa   :  { %s519_s23 = scalar_lea.vmem %s21_s13, 128  ;;  %p524_p4 = scmp.lt.s32.totalorder %s21_s13, %s21_s13 }
   0xb   :  { %p520_p3 = scmp.ne.s32.totalorder %s21_s13, %s519_s23  ;;  %p525_p5 = scmp.lt.s32.totalorder %s519_s23, %s519_s23 }
   0xd   :  { %p526_p6 = por %p525_p5, %p524_p4 }
   0xf   :  { %p527_p7 = pnand %p526_p6, %p520_p3 }
  0x11   :  { %530 = shalt.err (!%p527_p7)
}
  0x12   :  { %23 = dma.hbm_to_vmem [thread:$0]  %s852_s1, 128, %s21_s13, [#allocation5]  }
  0x13   :  { %s531_s28 = scalar_lea.hbm %s853_s2, 4096 }
  0x14   :  { %p532_p8 = scmp.ne.s32.totalorder %s853_s2, %s531_s28  ;;  %p535_p9 = scmp.lt.u32.totalorder %s531_s28, %s853_s2 }
  0x16   :  { %p537_p10 = pnand %p535_p9, %p532_p8 }
  0x18   :  { %540 = shalt.err (!%p537_p10)
}
  0x19   :  { %s541_s6 = scalar_lea.vmem %s606_s15, 4096  ;;  %p546_p12 = scmp.lt.s32.totalorder %s606_s15, %s606_s15 }
  0x1a   :  { %p542_p11 = scmp.ne.s32.totalorder %s606_s15, %s541_s6  ;;  %p547_p13 = scmp.lt.s32.totalorder %s541_s6, %s541_s6 }
  0x1c   :  { %p548_p0 = por %p547_p13, %p546_p12 }
  0x1e   :  { %p549_p1 = pnand %p548_p0, %p542_p11 }
  0x20   :  { %552 = shalt.err (!%p549_p1)
}
  0x21   :  { %s583_s1 = smov 128   ;;  %s584_s7 = smov 8  }
  0x22   :  { %35 = dma.hbm_to_vmem [thread:$0]  %s853_s2, 4096, %s606_s15, [#allocation8], %s583_s1, %s583_s1, %s584_s7  }
  0x23   :  { %575 = dma.done.wait [#allocation5], 128  }
  0x24   :  { %576 = vsyncadd [#allocation5], 4294967168 }
  0x25   :  { %577 = dma.done.wait [#allocation8], 4096  }
  0x26   :  { %578 = vsyncadd [#allocation8], 4294963200  ;;  %v637_v0 = vld [vmem:[#allocation7 + $0x80] sm:$0xff]  ;;  %v641_v2 = vld [vmem:[#allocation7 + $0x88] sm:$0xff] }
  0x27   :  { %v639_v1 = vld [vmem:[#allocation7] sm:$0xff]  ;;  %v95_v3 = vmul.f32 %v637_v0, %v637_v0  ;;  %v647_v5 = vld [vmem:[#allocation7 + $0x8] sm:$0xff]  ;;  %v96_v6 = vmul.f32 %v641_v2, %v641_v2  ;;  %v653_v8 = vld [vmem:[#allocation7 + $0x90] sm:$0xff] }
  0x28   :  { %v79_v4 = vmul.f32 %v639_v1, %v639_v1  ;;  %v80_v7 = vmul.f32 %v647_v5, %v647_v5  ;;  %v655_v9 = vld [vmem:[#allocation7 + $0x98] sm:$0xff]  ;;  %v97_v10 = vmul.f32 %v653_v8, %v653_v8  ;;  %v661_v12 = vld [vmem:[#allocation7 + $0x10] sm:$0xff]  ;;  %v669_v16 = vld [vmem:[#allocation7 + $0xa0] sm:$0xff] }
  0x29   :  { %143 = vadd.xlane.f32.xlu0 %v95_v3  ;;  %v98_v11 = vmul.f32 %v655_v9, %v655_v9  ;;  %v663_v13 = vld [vmem:[#allocation7 + $0x18] sm:$0xff]  ;;  %v81_v14 = vmul.f32 %v661_v12, %v661_v12  ;;  %v671_v17 = vld [vmem:[#allocation7 + $0xa8] sm:$0xff]  ;;  %v99_v18 = vmul.f32 %v669_v16, %v669_v16  ;;  %v677_v20 = vld [vmem:[#allocation7 + $0x20] sm:$0xff] }
  0x2a   :  { %111 = vadd.xlane.f32.xlu1 %v79_v4  ;;  %v82_v15 = vmul.f32 %v663_v13, %v663_v13  ;;  %v100_v19 = vmul.f32 %v671_v17, %v671_v17  ;;  %v679_v21 = vld [vmem:[#allocation7 + $0x28] sm:$0xff]  ;;  %v83_v22 = vmul.f32 %v677_v20, %v677_v20  ;;  %v685_v24 = vld [vmem:[#allocation7 + $0xb0] sm:$0xff]  ;;  %v687_v25 = vld [vmem:[#allocation7 + $0xb8] sm:$0xff] }
  0x2b   :  { %v84_v23 = vmul.f32 %v679_v21, %v679_v21  ;;  %v101_v26 = vmul.f32 %v685_v24, %v685_v24  ;;  %v102_v27 = vmul.f32 %v687_v25, %v687_v25  ;;  %v693_v28 = vld [vmem:[#allocation7 + $0x30] sm:$0xff]  ;;  %v695_v29 = vld [vmem:[#allocation7 + $0x38] sm:$0xff]  ;;  %v701_v32 = vld [vmem:[#allocation7 + $0xc0] sm:$0xff] }
  0x2c   :  { %v85_v30 = vmul.f32 %v693_v28, %v693_v28  ;;  %v86_v31 = vmul.f32 %v695_v29, %v695_v29  ;;  %v703_v33 = vld [vmem:[#allocation7 + $0xc8] sm:$0xff]  ;;  %v103_v34 = vmul.f32 %v701_v32, %v701_v32  ;;  %v709_v36 = vld [vmem:[#allocation7 + $0x40] sm:$0xff]  ;;  %v717_v40 = vld [vmem:[#allocation7 + $0xd0] sm:$0xff] }
  0x2d   :  { %145 = vadd.xlane.f32.xlu0 %v96_v6  ;;  %v104_v35 = vmul.f32 %v703_v33, %v703_v33  ;;  %v711_v37 = vld [vmem:[#allocation7 + $0x48] sm:$0xff]  ;;  %v87_v38 = vmul.f32 %v709_v36, %v709_v36  ;;  %v719_v41 = vld [vmem:[#allocation7 + $0xd8] sm:$0xff]  ;;  %v105_v42 = vmul.f32 %v717_v40, %v717_v40  ;;  %v725_v44 = vld [vmem:[#allocation7 + $0x50] sm:$0xff] }
  0x2e   :  { %113 = vadd.xlane.f32.xlu1 %v80_v7  ;;  %v88_v39 = vmul.f32 %v711_v37, %v711_v37  ;;  %v106_v43 = vmul.f32 %v719_v41, %v719_v41  ;;  %v727_v45 = vld [vmem:[#allocation7 + $0x58] sm:$0xff]  ;;  %v89_v46 = vmul.f32 %v725_v44, %v725_v44  ;;  %v733_v48 = vld [vmem:[#allocation7 + $0xe0] sm:$0xff]  ;;  %v735_v49 = vld [vmem:[#allocation7 + $0xe8] sm:$0xff] }
  0x2f   :  { %v90_v47 = vmul.f32 %v727_v45, %v727_v45  ;;  %v107_v50 = vmul.f32 %v733_v48, %v733_v48  ;;  %v108_v51 = vmul.f32 %v735_v49, %v735_v49  ;;  %v741_v52 = vld [vmem:[#allocation7 + $0x60] sm:$0xff]  ;;  %v743_v53 = vld [vmem:[#allocation7 + $0x68] sm:$0xff]  ;;  %v749_v56 = vld [vmem:[#allocation7 + $0xf0] sm:$0xff] }
  0x30   :  { %v91_v54 = vmul.f32 %v741_v52, %v741_v52  ;;  %v92_v55 = vmul.f32 %v743_v53, %v743_v53  ;;  %v751_v57 = vld [vmem:[#allocation7 + $0xf8] sm:$0xff]  ;;  %v109_v58 = vmul.f32 %v749_v56, %v749_v56  ;;  %v757_v60 = vld [vmem:[#allocation7 + $0x70] sm:$0xff] }
  0x31   :  { %147 = vadd.xlane.f32.xlu0 %v97_v10  ;;  %v110_v59 = vmul.f32 %v751_v57, %v751_v57  ;;  %v759_v61 = vld [vmem:[#allocation7 + $0x78] sm:$0xff]  ;;  %v93_v62 = vmul.f32 %v757_v60, %v757_v60 }
  0x32   :  { %149 = vadd.xlane.f32.xlu1 %v98_v11  ;;  %v94_v63 = vmul.f32 %v759_v61, %v759_v61  ;;  %v765_v3 = vld [vmem:[#allocation4] sm:$0xff] }
  0x33   :  { %v338_v4 = vmul.f32 %v765_v3, %v765_v3 }
  0x35   :  { %115 = vadd.xlane.f32.xlu0 %v81_v14 }
  0x36   :  { %117 = vadd.xlane.f32.xlu1 %v82_v15 }
  0x39   :  { %151 = vadd.xlane.f32.xlu0 %v99_v18 }
  0x3a   :  { %153 = vadd.xlane.f32.xlu1 %v100_v19 }
  0x3d   :  { %119 = vadd.xlane.f32.xlu0 %v83_v22 }
  0x3e   :  { %121 = vadd.xlane.f32.xlu1 %v84_v23 }
  0x41   :  { %155 = vadd.xlane.f32.xlu0 %v101_v26 }
  0x42   :  { %157 = vadd.xlane.f32.xlu1 %v102_v27 }
  0x45   :  { %123 = vadd.xlane.f32.xlu0 %v85_v30 }
  0x46   :  { %125 = vadd.xlane.f32.xlu1 %v86_v31 }
  0x49   :  { %159 = vadd.xlane.f32.xlu0 %v103_v34 }
  0x4a   :  { %161 = vadd.xlane.f32.xlu1 %v104_v35 }
  0x4d   :  { %127 = vadd.xlane.f32.xlu0 %v87_v38 }
  0x4e   :  { %129 = vadd.xlane.f32.xlu1 %v88_v39  ;;  %v772_v39 = vstv %s851_s0  ;;  %s585_s0 = smov [#allocation9]  }
  0x4f   :  { %s410_s11 = sshll.u32 %s585_s0, 4  ;;  %s411_s11 = int_to_ptr.vmem [resolvable:$true] %s410_s11 }
  0x50   :  { %s553_s12 = scalar_lea.vmem %s411_s11, 256  ;;  %p558_p3 = scmp.lt.s32.totalorder %s411_s11, %s411_s11 }
  0x51   :  { %163 = vadd.xlane.f32.xlu0 %v105_v42  ;;  %p554_p2 = scmp.ne.s32.totalorder %s411_s11, %s553_s12  ;;  %p559_p4 = scmp.lt.s32.totalorder %s553_s12, %s553_s12 }
  0x52   :  { %165 = vadd.xlane.f32.xlu1 %v106_v43 }
  0x53   :  { %p560_p5 = por %p559_p4, %p558_p3 }
  0x55   :  { %131 = vadd.xlane.f32.xlu0 %v89_v46  ;;  %p561_p6 = pnand %p560_p5, %p554_p2 }
  0x56   :  { %133 = vadd.xlane.f32.xlu1 %v90_v47 }
  0x59   :  { %167 = vadd.xlane.f32.xlu0 %v107_v50 }
  0x5a   :  { %169 = vadd.xlane.f32.xlu1 %v108_v51 }
  0x5d   :  { %135 = vadd.xlane.f32.xlu0 %v91_v54 }
  0x5e   :  { %137 = vadd.xlane.f32.xlu1 %v92_v55 }
  0x61   :  { %171 = vadd.xlane.f32.xlu0 %v109_v58 }
  0x62   :  { %173 = vadd.xlane.f32.xlu1 %v110_v59 }
  0x65   :  { %139 = vadd.xlane.f32.xlu0 %v93_v62 }
  0x66   :  { %141 = vadd.xlane.f32.xlu1 %v94_v63 }
  0x69   :  { %339 = vadd.xlane.f32.xlu0 %v338_v4 }
  0xb6   :  { %v144_v6 = vpop.xlane.xlu0 %143 }
  0xb7   :  { %v112_v7 = vpop.xlane.xlu1 %111  ;;  %v191_v10 = vadd.f32 1e-12, %v144_v6 }
  0xb8   :  { %v175_v11 = vadd.f32 1e-12, %v112_v7 }
  0xb9   :  { %443 = vrsqrt.f32 %v191_v10 }
  0xba   :  { %445 = vrsqrt.f32 %v175_v11  ;;  %v146_v14 = vpop.xlane.xlu0 %145 }
  0xbb   :  { %v114_v15 = vpop.xlane.xlu1 %113  ;;  %v192_v18 = vadd.f32 1e-12, %v146_v14 }
  0xbc   :  { %v176_v19 = vadd.f32 1e-12, %v114_v15 }
  0xbd   :  { %447 = vrsqrt.f32 %v192_v18 }
  0xbe   :  { %449 = vrsqrt.f32 %v176_v19  ;;  %v148_v22 = vpop.xlane.xlu0 %147 }
  0xbf   :  { %v150_v23 = vpop.xlane.xlu1 %149  ;;  %v193_v26 = vadd.f32 1e-12, %v148_v22 }
  0xc0   :  { %v194_v27 = vadd.f32 1e-12, %v150_v23 }
  0xc1   :  { %451 = vrsqrt.f32 %v193_v26 }
  0xc2   :  { %453 = vrsqrt.f32 %v194_v27  ;;  %v116_v30 = vpop.xlane.xlu0 %115 }
  0xc3   :  { %v118_v31 = vpop.xlane.xlu1 %117  ;;  %v444_v34 = vpop.eup %443  ;;  %v177_v35 = vadd.f32 1e-12, %v116_v30 }
  0xc4   :  { %v178_v38 = vadd.f32 1e-12, %v118_v31  ;;  %v446_v42 = vpop.eup %445  ;;  %v257_v47 = vmul.f32 %v444_v34, %v772_v39 }
  0xc5   :  { %455 = vrsqrt.f32 %v177_v35  ;;  %v241_v55 = vmul.f32 %v446_v42, %v772_v39 }
  0xc6   :  { %457 = vrsqrt.f32 %v178_v38  ;;  %v152_v43 = vpop.xlane.xlu0 %151  ;;  %v289_v6 = vmul.f32 %v257_v47, %v637_v0 }
  0xc7   :  { %v154_v46 = vpop.xlane.xlu1 %153  ;;  %v448_v50 = vpop.eup %447  ;;  %v195_v51 = vadd.f32 1e-12, %v152_v43  ;;  %v273_v15 = vmul.f32 %v241_v55, %v639_v1 }
  0xc8   :  { %v196_v54 = vadd.f32 1e-12, %v154_v46  ;;  %v450_v58 = vpop.eup %449  ;;  %v258_v59 = vmul.f32 %v448_v50, %v772_v39 }
  0xc9   :  { %459 = vrsqrt.f32 %v195_v51  ;;  %v242_v62 = vmul.f32 %v450_v58, %v772_v39 }
  0xca   :  { %461 = vrsqrt.f32 %v196_v54  ;;  %v120_v63 = vpop.xlane.xlu0 %119  ;;  %v290_v7 = vmul.f32 %v258_v59, %v641_v2 }
  0xcb   :  { %v122_v4 = vpop.xlane.xlu1 %121  ;;  %v452_v10 = vpop.eup %451  ;;  %v179_v11 = vadd.f32 1e-12, %v120_v63  ;;  %v274_v18 = vmul.f32 %v242_v62, %v647_v5 }
  0xcc   :  { %v180_v14 = vadd.f32 1e-12, %v122_v4  ;;  %v454_v19 = vpop.eup %453  ;;  %v313_v22 = vpack.c.bf16 %v290_v7, %v289_v6  ;;  %v259_v23 = vmul.f32 %v452_v10, %v772_v39 }
  0xcd   :  { %463 = vrsqrt.f32 %v179_v11  ;;  %v305_v26 = vpack.c.bf16 %v274_v18, %v273_v15  ;;  %v260_v27 = vmul.f32 %v454_v19, %v772_v39 }
  0xce   :  { %465 = vrsqrt.f32 %v180_v14  ;;  %420 = vmatprep.subr.bf16.mxu0 %v313_v22  ;;  %v156_v0 = vpop.xlane.xlu0 %155  ;;  %v291_v2 = vmul.f32 %v259_v23, %v653_v8 }
  0xcf   :  { %v158_v30 = vpop.xlane.xlu1 %157  ;;  %v456_v31 = vpop.eup %455  ;;  %v197_v34 = vadd.f32 1e-12, %v156_v0  ;;  %421 = vmatpush3.bf16.xpose.msra.mxu0 %v305_v26  ;;  %v292_v5 = vmul.f32 %v260_v27, %v655_v9 }
  0xd0   :  { %v198_v1 = vadd.f32 1e-12, %v158_v30  ;;  %v458_v35 = vpop.eup %457  ;;  %v243_v38 = vmul.f32 %v456_v31, %v772_v39 }
  0xd1   :  { %467 = vrsqrt.f32 %v197_v34  ;;  %v314_v42 = vpack.c.bf16 %v292_v5, %v291_v2  ;;  %v244_v43 = vmul.f32 %v458_v35, %v772_v39 }
  0xd2   :  { %469 = vrsqrt.f32 %v198_v1  ;;  %v124_v46 = vpop.xlane.xlu0 %123  ;;  %v275_v50 = vmul.f32 %v243_v38, %v661_v12 }
  0xd3   :  { %v126_v47 = vpop.xlane.xlu1 %125  ;;  %v460_v51 = vpop.eup %459  ;;  %v181_v8 = vadd.f32 1e-12, %v124_v46  ;;  %422 = vmatprep.subr.bf16.mxu0 %v314_v42  ;;  %v276_v55 = vmul.f32 %v244_v43, %v663_v13 }
  0xd4   :  { %v182_v54 = vadd.f32 1e-12, %v126_v47  ;;  %v462_v58 = vpop.eup %461  ;;  %v261_v9 = vmul.f32 %v460_v51, %v772_v39 }
  0xd5   :  { %471 = vrsqrt.f32 %v181_v8  ;;  %v306_v59 = vpack.c.bf16 %v276_v55, %v275_v50  ;;  %v262_v62 = vmul.f32 %v462_v58, %v772_v39 }
  0xd6   :  { %473 = vrsqrt.f32 %v182_v54  ;;  %v160_v63 = vpop.xlane.xlu0 %159  ;;  %v293_v6 = vmul.f32 %v261_v9, %v669_v16 }
  0xd7   :  { %v162_v4 = vpop.xlane.xlu1 %161  ;;  %v464_v7 = vpop.eup %463  ;;  %v199_v12 = vadd.f32 1e-12, %v160_v63  ;;  %423 = vmatpush3.bf16.xpose.msra.mxu0 %v306_v59  ;;  %v294_v11 = vmul.f32 %v262_v62, %v671_v17 }
  0xd8   :  { %v200_v10 = vadd.f32 1e-12, %v162_v4  ;;  %v466_v14 = vpop.eup %465  ;;  %v245_v13 = vmul.f32 %v464_v7, %v772_v39 }
  0xd9   :  { %475 = vrsqrt.f32 %v199_v12  ;;  %v315_v15 = vpack.c.bf16 %v294_v11, %v293_v6  ;;  %v246_v18 = vmul.f32 %v466_v14, %v772_v39 }
  0xda   :  { %477 = vrsqrt.f32 %v200_v10  ;;  %v128_v19 = vpop.xlane.xlu0 %127  ;;  %v277_v23 = vmul.f32 %v245_v13, %v677_v20 }
  0xdb   :  { %v130_v22 = vpop.xlane.xlu1 %129  ;;  %v468_v26 = vpop.eup %467  ;;  %v183_v16 = vadd.f32 1e-12, %v128_v19  ;;  %424 = vmatprep.subr.bf16.mxu0 %v315_v15  ;;  %v278_v0 = vmul.f32 %v246_v18, %v679_v21 }
  0xdc   :  { %v184_v27 = vadd.f32 1e-12, %v130_v22  ;;  %v470_v30 = vpop.eup %469  ;;  %v263_v17 = vmul.f32 %v468_v26, %v772_v39 }
  0xdd   :  { %479 = vrsqrt.f32 %v183_v16  ;;  %v307_v2 = vpack.c.bf16 %v278_v0, %v277_v23  ;;  %v264_v31 = vmul.f32 %v470_v30, %v772_v39 }
  0xde   :  { %481 = vrsqrt.f32 %v184_v27  ;;  %v164_v34 = vpop.xlane.xlu0 %163  ;;  %v295_v5 = vmul.f32 %v263_v17, %v685_v24 }
  0xdf   :  { %v166_v1 = vpop.xlane.xlu1 %165  ;;  %v472_v35 = vpop.eup %471  ;;  %v201_v20 = vadd.f32 1e-12, %v164_v34  ;;  %425 = vmatpush3.bf16.xpose.msra.mxu0 %v307_v2  ;;  %v296_v42 = vmul.f32 %v264_v31, %v687_v25 }
  0xe0   :  { %v202_v38 = vadd.f32 1e-12, %v166_v1  ;;  %v474_v43 = vpop.eup %473  ;;  %v247_v21 = vmul.f32 %v472_v35, %v772_v39 }
  0xe1   :  { %483 = vrsqrt.f32 %v201_v20  ;;  %v316_v46 = vpack.c.bf16 %v296_v42, %v295_v5  ;;  %v248_v47 = vmul.f32 %v474_v43, %v772_v39 }
  0xe2   :  { %485 = vrsqrt.f32 %v202_v38  ;;  %v132_v50 = vpop.xlane.xlu0 %131  ;;  %v279_v8 = vmul.f32 %v247_v21, %v693_v28 }
  0xe3   :  { %v134_v51 = vpop.xlane.xlu1 %133  ;;  %v476_v54 = vpop.eup %475  ;;  %v185_v24 = vadd.f32 1e-12, %v132_v50  ;;  %426 = vmatprep.subr.bf16.mxu0 %v316_v46  ;;  %v280_v58 = vmul.f32 %v248_v47, %v695_v29 }
  0xe4   :  { %v186_v55 = vadd.f32 1e-12, %v134_v51  ;;  %v478_v9 = vpop.eup %477  ;;  %v265_v25 = vmul.f32 %v476_v54, %v772_v39 }
  0xe5   :  { %487 = vrsqrt.f32 %v185_v24  ;;  %v308_v59 = vpack.c.bf16 %v280_v58, %v279_v8  ;;  %v266_v62 = vmul.f32 %v478_v9, %v772_v39 }
  0xe6   :  { %489 = vrsqrt.f32 %v186_v55  ;;  %v168_v63 = vpop.xlane.xlu0 %167  ;;  %v297_v6 = vmul.f32 %v265_v25, %v701_v32 }
  0xe7   :  { %v170_v4 = vpop.xlane.xlu1 %169  ;;  %v480_v7 = vpop.eup %479  ;;  %v203_v28 = vadd.f32 1e-12, %v168_v63  ;;  %427 = vmatpush3.bf16.xpose.msra.mxu0 %v308_v59  ;;  %v298_v10 = vmul.f32 %v266_v62, %v703_v33 }
  0xe8   :  { %v204_v12 = vadd.f32 1e-12, %v170_v4  ;;  %v482_v11 = vpop.eup %481  ;;  %v249_v29 = vmul.f32 %v480_v7, %v772_v39 }
  0xe9   :  { %491 = vrsqrt.f32 %v203_v28  ;;  %v317_v14 = vpack.c.bf16 %v298_v10, %v297_v6  ;;  %v250_v13 = vmul.f32 %v482_v11, %v772_v39 }
  0xea   :  { %493 = vrsqrt.f32 %v204_v12  ;;  %v136_v15 = vpop.xlane.xlu0 %135  ;;  %v281_v19 = vmul.f32 %v249_v29, %v709_v36 }
  0xeb   :  { %v138_v18 = vpop.xlane.xlu1 %137  ;;  %v484_v22 = vpop.eup %483  ;;  %v187_v32 = vadd.f32 1e-12, %v136_v15  ;;  %428 = vmatprep.subr.bf16.mxu0 %v317_v14  ;;  %v282_v26 = vmul.f32 %v250_v13, %v711_v37 }
  0xec   :  { %v188_v23 = vadd.f32 1e-12, %v138_v18  ;;  %v486_v16 = vpop.eup %485  ;;  %v267_v33 = vmul.f32 %v484_v22, %v772_v39 }
  0xed   :  { %495 = vrsqrt.f32 %v187_v32  ;;  %v309_v27 = vpack.c.bf16 %v282_v26, %v281_v19  ;;  %v268_v0 = vmul.f32 %v486_v16, %v772_v39 }
  0xee   :  { %497 = vrsqrt.f32 %v188_v23  ;;  %v172_v30 = vpop.xlane.xlu0 %171  ;;  %v299_v2 = vmul.f32 %v267_v33, %v717_v40 }
  0xef   :  { %v174_v17 = vpop.xlane.xlu1 %173  ;;  %v488_v31 = vpop.eup %487  ;;  %v205_v36 = vadd.f32 1e-12, %v172_v30  ;;  %429 = vmatpush3.bf16.xpose.msra.mxu0 %v309_v27  ;;  %v300_v1 = vmul.f32 %v268_v0, %v719_v41 }
  0xf0   :  { %v206_v34 = vadd.f32 1e-12, %v174_v17  ;;  %v490_v5 = vpop.eup %489  ;;  %v251_v37 = vmul.f32 %v488_v31, %v772_v39 }
  0xf1   :  { %499 = vrsqrt.f32 %v205_v36  ;;  %v318_v35 = vpack.c.bf16 %v300_v1, %v299_v2  ;;  %v252_v20 = vmul.f32 %v490_v5, %v772_v39 }
  0xf2   :  { %501 = vrsqrt.f32 %v206_v34  ;;  %v140_v38 = vpop.xlane.xlu0 %139  ;;  %v283_v43 = vmul.f32 %v251_v37, %v725_v44 }
  0xf3   :  { %v142_v42 = vpop.xlane.xlu1 %141  ;;  %v492_v21 = vpop.eup %491  ;;  %v189_v40 = vadd.f32 1e-12, %v140_v38  ;;  %430 = vmatprep.subr.bf16.mxu0 %v318_v35  ;;  %v284_v47 = vmul.f32 %v252_v20, %v727_v45 }
  0xf4   :  { %v190_v46 = vadd.f32 1e-12, %v142_v42  ;;  %v494_v50 = vpop.eup %493  ;;  %v269_v41 = vmul.f32 %v492_v21, %v772_v39 }
  0xf5   :  { %503 = vrsqrt.f32 %v189_v40  ;;  %v310_v51 = vpack.c.bf16 %v284_v47, %v283_v43  ;;  %v270_v8 = vmul.f32 %v494_v50, %v772_v39 }
  0xf6   :  { %505 = vrsqrt.f32 %v190_v46  ;;  %v340_v54 = vpop.xlane.xlu0 %339  ;;  %v301_v24 = vmul.f32 %v269_v41, %v733_v48 }
  0xf7   :  { %v496_v55 = vpop.eup %495  ;;  %431 = vmatpush3.bf16.xpose.msra.mxu0 %v310_v51  ;;  %v341_v44 = vadd.f32 1e-12, %v340_v54  ;;  %v302_v58 = vmul.f32 %v270_v8, %v735_v49 }
  0xf8   :  { %v498_v9 = vpop.eup %497  ;;  %v253_v25 = vmul.f32 %v496_v55, %v772_v39 }
  0xf9   :  { %507 = vrsqrt.f32 %v341_v44  ;;  %v319_v45 = vpack.c.bf16 %v302_v58, %v301_v24  ;;  %v254_v59 = vmul.f32 %v498_v9, %v772_v39 }
  0xfa   :  { %v285_v62 = vmul.f32 %v253_v25, %v741_v52 }
  0xfb   :  { %v500_v63 = vpop.eup %499  ;;  %432 = vmatprep.subr.bf16.mxu0 %v319_v45  ;;  %v286_v4 = vmul.f32 %v254_v59, %v743_v53 }
  0xfc   :  { %v502_v6 = vpop.eup %501  ;;  %v271_v48 = vmul.f32 %v500_v63, %v772_v39 }
  0xfd   :  { %v311_v7 = vpack.c.bf16 %v286_v4, %v285_v62  ;;  %v272_v28 = vmul.f32 %v502_v6, %v772_v39 }
  0xfe   :  { %v303_v49 = vmul.f32 %v271_v48, %v749_v56 }
  0xff   :  { %v504_v12 = vpop.eup %503  ;;  %433 = vmatpush3.bf16.xpose.msra.mxu0 %v311_v7  ;;  %v304_v10 = vmul.f32 %v272_v28, %v751_v57 }
 0x100   :  { %v506_v11 = vpop.eup %505  ;;  %v255_v29 = vmul.f32 %v504_v12, %v772_v39 }
 0x101   :  { %v320_v52 = vpack.c.bf16 %v304_v10, %v303_v49  ;;  %v256_v14 = vmul.f32 %v506_v11, %v772_v39 }
 0x102   :  { %v287_v53 = vmul.f32 %v255_v29, %v757_v60 }
 0x103   :  { %v508_v13 = vpop.eup %507  ;;  %434 = vmatprep.subr.bf16.mxu0 %v320_v52  ;;  %v288_v15 = vmul.f32 %v256_v14, %v759_v61 }
 0x104   :  { %v343_v18 = vmul.f32 %v508_v13, %v765_v3 }
 0x105   :  { %v312_v19 = vpack.c.bf16 %v288_v15, %v287_v53 }
 0x106   :  { %v344_v56 = vpack.c.bf16 %v343_v18, %v343_v18 }
 0x107   :  { %435 = vmatpush3.bf16.xpose.msra.mxu0 %v312_v19 }
 0x108   :  { %436 = vmatprep.mubr.bf16.mxu0 %v344_v56 }
 0x10e   :  { %437 = vmatmul.mubr.bf16.vlgmr.msra.gmra.mrb[0].mxu0 %v344_v56 }
 0x1e1   :  { %v395_v57 = vpop.f32.mrb[0].mxu0 }
 0x1e2   :  { %402 = vst [vmem:[#allocation9] sm:$0xff] %v395_v57  ;;  %v397_v22 = vpop.f32.mrb[1].mxu0 }
 0x1e3   :  { %403 = vst [vmem:[#allocation9 + $0x8] sm:$0xff] %v397_v22  ;;  %v399_v39 = vpop.f32.mrb[2].mxu0 }
 0x1e4   :  { %v400_v60 = vpop.f32.mrb[3].mxu0 }
 0x1e5   :  { %564 = shalt.err (!%p561_p6)
}
 0x1e6   :  { %s565_s15 = scalar_lea.hbm %s854_s3, 256 }
 0x1e7   :  { %p566_p7 = scmp.ne.s32.totalorder %s854_s3, %s565_s15  ;;  %p569_p8 = scmp.lt.u32.totalorder %s565_s15, %s854_s3 }
 0x1e9   :  { %p571_p9 = pnand %p569_p8, %p566_p7 }
 0x1eb   :  { %574 = shalt.err (!%p571_p9)
}
 0x1ec   :  { %413 = dma.vmem_to_hbm [thread:$0]  %s411_s11, 256, %s854_s3, [#allocation6]  }
 0x1ed   :  { %579 = dma.done.wait [#allocation6], 256  }
 0x1ee   :  { %580 = vsyncadd [#allocation6], 4294967040 }
 0x1ef   :  { %417 = vsyncpa [#allocation5], 1 }
 0x1f0   :  { %418 = vsyncpa [#allocation8], 1 }
 0x1f1   :  { %419 = vsyncpa [#allocation6], 1 }

</bundles_post_ra>
